<compile_context>
chip_gen: v7x
topology: tpu7x:2x2x1
jax: 0.10.0
libtpu: 0.0.40
codegen_flags: <defaults>
</compile_context>

<pallas_src>
import math

import jax
import jax.numpy as jnp
from jax.experimental import pallas as pl
from jax.experimental.pallas import tpu as pltpu

BN_EPS = 1e-5

# ---- static architecture (small shapes consistent with the module) ----------------
# shared_layer_sizes  = [D_IN, D_S1, D_S2]
# private_layer_sizes = [D_S2, D_P1, D_OUT]
BATCH = 8
D_IN, D_S1, D_S2 = 16, 32, 32
D_P1, D_OUT = 32, 8
N_BRANCH = 3
D_P1F = N_BRANCH * D_P1     # 96  (fused private hidden width)
D_OUTF = N_BRANCH * D_OUT   # 24  (fused output width)

# weight-slab row offsets (all multiples of 8 -> aligned sublane slices)
R_WS1 = 0
R_WS2 = R_WS1 + D_IN        # 16
R_WP1 = R_WS2 + D_S1        # 48
R_TOT = R_WP1 + D_S2        # 80
W_MAX = max(D_S1, D_S2, D_P1F)  # 96

# param-slab rows: 0 g_s1, 1 be_s1, 2 g_s2, 3 be_s2, 4 g_p1f, 5 be_p1f, 6 b_p2f
P_ROWS = 8


def _mt_mlp_kernel(x_ref, w_ref, wp2_ref, p_ref, out_ref):
    def bn_relu(h, g_row, be_row, width):
        # training-mode BN folded into one scale/shift, fused with ReLU
        g = p_ref[g_row:g_row + 1, 0:width]
        be = p_ref[be_row:be_row + 1, 0:width]
        mean = jnp.mean(h, axis=0, keepdims=True)
        var = jnp.mean((h - mean) * (h - mean), axis=0, keepdims=True)
        scale = g * jax.lax.rsqrt(var + BN_EPS)
        shift = be - mean * scale
        return jnp.maximum(h * scale + shift, 0.0)

    x = x_ref[...]

    # shared layer 1 (bias dropped: cancelled by BN mean subtraction)
    h = jnp.dot(x, w_ref[R_WS1:R_WS1 + D_IN, 0:D_S1],
                preferred_element_type=jnp.float32)
    h = bn_relu(h, 0, 1, D_S1)

    # shared layer 2
    h = jnp.dot(h, w_ref[R_WS2:R_WS2 + D_S1, 0:D_S2],
                preferred_element_type=jnp.float32)
    s = bn_relu(h, 2, 3, D_S2)

    # fused private hidden layer: 3 branches concatenated along output features
    hp = jnp.dot(s, w_ref[R_WP1:R_WP1 + D_S2, 0:D_P1F],
                 preferred_element_type=jnp.float32)
    hp = bn_relu(hp, 4, 5, D_P1F)

    # fused private output layer (block-diagonal weight), bias kept (no BN after)
    y = jnp.dot(hp, wp2_ref[...], preferred_element_type=jnp.float32)
    out_ref[...] = y + p_ref[6:7, 0:D_OUTF]


def mt_mlp_forward(x, w_slab, wp2_bd, p_slab):
    B = x.shape[0]
    vmem = pl.BlockSpec(memory_space=pltpu.MemorySpace.VMEM)
    flops = 2 * B * (D_IN * D_S1 + D_S1 * D_S2 + D_S2 * D_P1F + D_P1F * D_OUTF)
    bytes_accessed = 4 * (x.size + w_slab.size + wp2_bd.size + p_slab.size + B * D_OUTF)
    out = pl.pallas_call(
        _mt_mlp_kernel,
        out_shape=jax.ShapeDtypeStruct((B, D_OUTF), jnp.float32),
        in_specs=[vmem, vmem, vmem, vmem],
        out_specs=vmem,
        cost_estimate=pl.CostEstimate(
            flops=flops,
            transcendentals=D_S1 + D_S2 + D_P1F,   # rsqrt per BN column
            bytes_accessed=bytes_accessed,
        ),
    )(x, w_slab, wp2_bd, p_slab)
    # split fused output into the three branch outputs
    return out[:, 0:D_OUT], out[:, D_OUT:2 * D_OUT], out[:, 2 * D_OUT:3 * D_OUT]


def init_params(key):
    """Mirror Mt_Direct_Predict_MLP._init_weights(); weights stored (in, out).
    The three private nets share one parameter set (as in the PyTorch module)."""
    ks = jax.random.split(key, 8)
    gain = math.sqrt(2.0)  # nn.init.calculate_gain('relu')

    def xavier(k, fin, fout):
        lim = gain * math.sqrt(6.0 / (fin + fout))
        return jax.random.uniform(k, (fin, fout), minval=-lim, maxval=lim,
                                  dtype=jnp.float32)

    def bias(k, n):
        return jax.random.uniform(k, (n,), minval=-0.1, maxval=0.1,
                                  dtype=jnp.float32)

    return dict(
        ws1=xavier(ks[0], D_IN, D_S1), bs1=bias(ks[1], D_S1),
        gs1=jnp.ones(D_S1, jnp.float32), bes1=jnp.zeros(D_S1, jnp.float32),
        ws2=xavier(ks[2], D_S1, D_S2), bs2=bias(ks[3], D_S2),
        gs2=jnp.ones(D_S2, jnp.float32), bes2=jnp.zeros(D_S2, jnp.float32),
        wp1=xavier(ks[4], D_S2, D_P1), bp1=bias(ks[5], D_P1),
        gp1=jnp.ones(D_P1, jnp.float32), bep1=jnp.zeros(D_P1, jnp.float32),
        wp2=xavier(ks[6], D_P1, D_OUT), bp2=bias(ks[7], D_OUT),
    )


def pack_params(p):
    """Pack parameters into 3 kernel inputs (weight slab, block-diag fc-out, bn/bias slab)."""
    w_slab = jnp.zeros((R_TOT, W_MAX), jnp.float32)
    w_slab = w_slab.at[R_WS1:R_WS1 + D_IN, 0:D_S1].set(p["ws1"])
    w_slab = w_slab.at[R_WS2:R_WS2 + D_S1, 0:D_S2].set(p["ws2"])
    wp1f = jnp.concatenate([p["wp1"]] * N_BRANCH, axis=1)          # (D_S2, 3*D_P1)
    w_slab = w_slab.at[R_WP1:R_WP1 + D_S2, 0:D_P1F].set(wp1f)

    wp2_bd = jnp.zeros((D_P1F, D_OUTF), jnp.float32)
    for k in range(N_BRANCH):
        wp2_bd = wp2_bd.at[k * D_P1:(k + 1) * D_P1,
                           k * D_OUT:(k + 1) * D_OUT].set(p["wp2"])

    p_slab = jnp.zeros((P_ROWS, W_MAX), jnp.float32)
    p_slab = p_slab.at[0, 0:D_S1].set(p["gs1"])
    p_slab = p_slab.at[1, 0:D_S1].set(p["bes1"])
    p_slab = p_slab.at[2, 0:D_S2].set(p["gs2"])
    p_slab = p_slab.at[3, 0:D_S2].set(p["bes2"])
    p_slab = p_slab.at[4, 0:D_P1F].set(jnp.concatenate([p["gp1"]] * N_BRANCH))
    p_slab = p_slab.at[5, 0:D_P1F].set(jnp.concatenate([p["bep1"]] * N_BRANCH))
    p_slab = p_slab.at[6, 0:D_OUTF].set(jnp.concatenate([p["bp2"]] * N_BRANCH))
    return w_slab, wp2_bd, p_slab


def _reference_forward(x, p):
    """Pure-JAX reference: unfused, with all Linear biases, per-branch evaluation."""
    def lin_bn_relu(h_in, w, b, g, be):
        h = h_in @ w + b
        mean = h.mean(axis=0, keepdims=True)
        var = ((h - mean) ** 2).mean(axis=0, keepdims=True)
        return jnp.maximum((h - mean) / jnp.sqrt(var + BN_EPS) * g + be, 0.0)

    s = lin_bn_relu(x, p["ws1"], p["bs1"], p["gs1"], p["bes1"])
    s = lin_bn_relu(s, p["ws2"], p["bs2"], p["gs2"], p["bes2"])
    outs = []
    for _ in range(N_BRANCH):  # the three private nets share parameters
        h = lin_bn_relu(s, p["wp1"], p["bp1"], p["gp1"], p["bep1"])
        outs.append(h @ p["wp2"] + p["bp2"])
    return tuple(outs)


if __name__ == "__main__":
    key = jax.random.PRNGKey(0)
    kx, kp = jax.random.split(key)
    x = jax.random.normal(kx, (BATCH, D_IN), dtype=jnp.float32)
    params = init_params(kp)
    w_slab, wp2_bd, p_slab = pack_params(params)

    o1, o2, o3 = jax.block_until_ready(mt_mlp_forward(x, w_slab, wp2_bd, p_slab))
    r1, r2, r3 = _reference_forward(x, params)

    assert o1.shape == (BATCH, D_OUT) and o2.shape == (BATCH, D_OUT) and o3.shape == (BATCH, D_OUT)
    for o, r in zip((o1, o2, o3), (r1, r2, r3)):
        assert jnp.allclose(o, r, atol=1e-4, rtol=1e-4)
    print("KERNEL_OK")
</pallas_src>

<mosaic_0001>
module attributes {stable_mosaic.version = 11 : i64} {
  func.func @_mt_mlp_kernel(%arg0: memref<8x16xf32, #tpu.memory_space<vmem>>, %arg1: memref<80x96xf32, #tpu.memory_space<vmem>>, %arg2: memref<96x24xf32, #tpu.memory_space<vmem>>, %arg3: memref<8x96xf32, #tpu.memory_space<vmem>>, %arg4: memref<8x24xf32, #tpu.memory_space<vmem>>) attributes {dimension_semantics = [], scalar_prefetch = 0 : i64, scratch_operands = 0 : i64, tpu.core_type = #tpu.core_type<tc>} {
    %c0 = arith.constant 0 : index
    %c0_0 = arith.constant 0 : index
    %0 = vector.load %arg0[%c0, %c0_0] : memref<8x16xf32, #tpu.memory_space<vmem>>, vector<8x16xf32>
    %c0_1 = arith.constant 0 : index
    %c0_2 = arith.constant 0 : index
    %1 = vector.load %arg1[%c0_1, %c0_2] : memref<80x96xf32, #tpu.memory_space<vmem>>, vector<16x32xf32>
    %cst = arith.constant dense<0.000000e+00> : vector<8x32xf32>
    %2 = tpu.matmul %0, %1, %cst {dimension_numbers = #tpu.dot_dimension_numbers<[1], [0], [0], [1], [0, 0, 1, 1], [], []>} : vector<8x16xf32>, vector<16x32xf32>, vector<8x32xf32> -> vector<8x32xf32>
    %c0_3 = arith.constant 0 : index
    %c0_4 = arith.constant 0 : index
    %3 = vector.load %arg3[%c0_3, %c0_4] : memref<8x96xf32, #tpu.memory_space<vmem>>, vector<1x32xf32>
    %c1 = arith.constant 1 : index
    %c0_5 = arith.constant 0 : index
    %4 = vector.load %arg3[%c1, %c0_5] : memref<8x96xf32, #tpu.memory_space<vmem>>, vector<1x32xf32>
    %cst_6 = arith.constant dense<0.000000e+00> : vector<32xf32>
    %5 = vector.multi_reduction <add>, %2, %cst_6 [0] : vector<8x32xf32> to vector<32xf32>
    %6 = vector.shape_cast %5 : vector<32xf32> to vector<1x32xf32>
    %cst_7 = arith.constant 8.000000e+00 : f32
    %7 = vector.broadcast %cst_7 : f32 to vector<1x32xf32>
    %8 = arith.divf %6, %7 : vector<1x32xf32>
    %9 = vector.broadcast %8 : vector<1x32xf32> to vector<8x32xf32>
    %10 = arith.subf %2, %9 : vector<8x32xf32>
    %11 = vector.broadcast %8 : vector<1x32xf32> to vector<8x32xf32>
    %12 = arith.subf %2, %11 : vector<8x32xf32>
    %13 = arith.mulf %10, %12 : vector<8x32xf32>
    %cst_8 = arith.constant dense<0.000000e+00> : vector<32xf32>
    %14 = vector.multi_reduction <add>, %13, %cst_8 [0] : vector<8x32xf32> to vector<32xf32>
    %15 = vector.shape_cast %14 : vector<32xf32> to vector<1x32xf32>
    %cst_9 = arith.constant 8.000000e+00 : f32
    %16 = vector.broadcast %cst_9 : f32 to vector<1x32xf32>
    %17 = arith.divf %15, %16 : vector<1x32xf32>
    %cst_10 = arith.constant 9.99999974E-6 : f32
    %18 = vector.broadcast %cst_10 : f32 to vector<1x32xf32>
    %19 = arith.addf %17, %18 : vector<1x32xf32>
    %20 = math.rsqrt %19 : vector<1x32xf32>
    %21 = arith.mulf %3, %20 : vector<1x32xf32>
    %22 = arith.mulf %8, %21 : vector<1x32xf32>
    %23 = arith.subf %4, %22 : vector<1x32xf32>
    %24 = vector.broadcast %21 : vector<1x32xf32> to vector<8x32xf32>
    %25 = arith.mulf %2, %24 : vector<8x32xf32>
    %26 = vector.broadcast %23 : vector<1x32xf32> to vector<8x32xf32>
    %27 = arith.addf %25, %26 : vector<8x32xf32>
    %cst_11 = arith.constant 0.000000e+00 : f32
    %28 = vector.broadcast %cst_11 : f32 to vector<8x32xf32>
    %29 = arith.maximumf %27, %28 : vector<8x32xf32>
    %c16 = arith.constant 16 : index
    %c0_12 = arith.constant 0 : index
    %30 = vector.load %arg1[%c16, %c0_12] : memref<80x96xf32, #tpu.memory_space<vmem>>, vector<32x32xf32>
    %cst_13 = arith.constant dense<0.000000e+00> : vector<8x32xf32>
    %31 = tpu.matmul %29, %30, %cst_13 {dimension_numbers = #tpu.dot_dimension_numbers<[1], [0], [0], [1], [0, 0, 1, 1], [], []>} : vector<8x32xf32>, vector<32x32xf32>, vector<8x32xf32> -> vector<8x32xf32>
    %c2 = arith.constant 2 : index
    %c0_14 = arith.constant 0 : index
    %32 = vector.load %arg3[%c2, %c0_14] : memref<8x96xf32, #tpu.memory_space<vmem>>, vector<1x32xf32>
    %c3 = arith.constant 3 : index
    %c0_15 = arith.constant 0 : index
    %33 = vector.load %arg3[%c3, %c0_15] : memref<8x96xf32, #tpu.memory_space<vmem>>, vector<1x32xf32>
    %cst_16 = arith.constant dense<0.000000e+00> : vector<32xf32>
    %34 = vector.multi_reduction <add>, %31, %cst_16 [0] : vector<8x32xf32> to vector<32xf32>
    %35 = vector.shape_cast %34 : vector<32xf32> to vector<1x32xf32>
    %cst_17 = arith.constant 8.000000e+00 : f32
    %36 = vector.broadcast %cst_17 : f32 to vector<1x32xf32>
    %37 = arith.divf %35, %36 : vector<1x32xf32>
    %38 = vector.broadcast %37 : vector<1x32xf32> to vector<8x32xf32>
    %39 = arith.subf %31, %38 : vector<8x32xf32>
    %40 = vector.broadcast %37 : vector<1x32xf32> to vector<8x32xf32>
    %41 = arith.subf %31, %40 : vector<8x32xf32>
    %42 = arith.mulf %39, %41 : vector<8x32xf32>
    %cst_18 = arith.constant dense<0.000000e+00> : vector<32xf32>
    %43 = vector.multi_reduction <add>, %42, %cst_18 [0] : vector<8x32xf32> to vector<32xf32>
    %44 = vector.shape_cast %43 : vector<32xf32> to vector<1x32xf32>
    %cst_19 = arith.constant 8.000000e+00 : f32
    %45 = vector.broadcast %cst_19 : f32 to vector<1x32xf32>
    %46 = arith.divf %44, %45 : vector<1x32xf32>
    %cst_20 = arith.constant 9.99999974E-6 : f32
    %47 = vector.broadcast %cst_20 : f32 to vector<1x32xf32>
    %48 = arith.addf %46, %47 : vector<1x32xf32>
    %49 = math.rsqrt %48 : vector<1x32xf32>
    %50 = arith.mulf %32, %49 : vector<1x32xf32>
    %51 = arith.mulf %37, %50 : vector<1x32xf32>
    %52 = arith.subf %33, %51 : vector<1x32xf32>
    %53 = vector.broadcast %50 : vector<1x32xf32> to vector<8x32xf32>
    %54 = arith.mulf %31, %53 : vector<8x32xf32>
    %55 = vector.broadcast %52 : vector<1x32xf32> to vector<8x32xf32>
    %56 = arith.addf %54, %55 : vector<8x32xf32>
    %cst_21 = arith.constant 0.000000e+00 : f32
    %57 = vector.broadcast %cst_21 : f32 to vector<8x32xf32>
    %58 = arith.maximumf %56, %57 : vector<8x32xf32>
    %c48 = arith.constant 48 : index
    %c0_22 = arith.constant 0 : index
    %59 = vector.load %arg1[%c48, %c0_22] : memref<80x96xf32, #tpu.memory_space<vmem>>, vector<32x96xf32>
    %cst_23 = arith.constant dense<0.000000e+00> : vector<8x96xf32>
    %60 = tpu.matmul %58, %59, %cst_23 {dimension_numbers = #tpu.dot_dimension_numbers<[1], [0], [0], [1], [0, 0, 1, 1], [], []>} : vector<8x32xf32>, vector<32x96xf32>, vector<8x96xf32> -> vector<8x96xf32>
    %c4 = arith.constant 4 : index
    %c0_24 = arith.constant 0 : index
    %61 = vector.load %arg3[%c4, %c0_24] : memref<8x96xf32, #tpu.memory_space<vmem>>, vector<1x96xf32>
    %c5 = arith.constant 5 : index
    %c0_25 = arith.constant 0 : index
    %62 = vector.load %arg3[%c5, %c0_25] : memref<8x96xf32, #tpu.memory_space<vmem>>, vector<1x96xf32>
    %cst_26 = arith.constant dense<0.000000e+00> : vector<96xf32>
    %63 = vector.multi_reduction <add>, %60, %cst_26 [0] : vector<8x96xf32> to vector<96xf32>
    %64 = vector.shape_cast %63 : vector<96xf32> to vector<1x96xf32>
    %cst_27 = arith.constant 8.000000e+00 : f32
    %65 = vector.broadcast %cst_27 : f32 to vector<1x96xf32>
    %66 = arith.divf %64, %65 : vector<1x96xf32>
    %67 = vector.broadcast %66 : vector<1x96xf32> to vector<8x96xf32>
    %68 = arith.subf %60, %67 : vector<8x96xf32>
    %69 = vector.broadcast %66 : vector<1x96xf32> to vector<8x96xf32>
    %70 = arith.subf %60, %69 : vector<8x96xf32>
    %71 = arith.mulf %68, %70 : vector<8x96xf32>
    %cst_28 = arith.constant dense<0.000000e+00> : vector<96xf32>
    %72 = vector.multi_reduction <add>, %71, %cst_28 [0] : vector<8x96xf32> to vector<96xf32>
    %73 = vector.shape_cast %72 : vector<96xf32> to vector<1x96xf32>
    %cst_29 = arith.constant 8.000000e+00 : f32
    %74 = vector.broadcast %cst_29 : f32 to vector<1x96xf32>
    %75 = arith.divf %73, %74 : vector<1x96xf32>
    %cst_30 = arith.constant 9.99999974E-6 : f32
    %76 = vector.broadcast %cst_30 : f32 to vector<1x96xf32>
    %77 = arith.addf %75, %76 : vector<1x96xf32>
    %78 = math.rsqrt %77 : vector<1x96xf32>
    %79 = arith.mulf %61, %78 : vector<1x96xf32>
    %80 = arith.mulf %66, %79 : vector<1x96xf32>
    %81 = arith.subf %62, %80 : vector<1x96xf32>
    %82 = vector.broadcast %79 : vector<1x96xf32> to vector<8x96xf32>
    %83 = arith.mulf %60, %82 : vector<8x96xf32>
    %84 = vector.broadcast %81 : vector<1x96xf32> to vector<8x96xf32>
    %85 = arith.addf %83, %84 : vector<8x96xf32>
    %cst_31 = arith.constant 0.000000e+00 : f32
    %86 = vector.broadcast %cst_31 : f32 to vector<8x96xf32>
    %87 = arith.maximumf %85, %86 : vector<8x96xf32>
    %c0_32 = arith.constant 0 : index
    %c0_33 = arith.constant 0 : index
    %88 = vector.load %arg2[%c0_32, %c0_33] : memref<96x24xf32, #tpu.memory_space<vmem>>, vector<96x24xf32>
    %cst_34 = arith.constant dense<0.000000e+00> : vector<8x24xf32>
    %89 = tpu.matmul %87, %88, %cst_34 {dimension_numbers = #tpu.dot_dimension_numbers<[1], [0], [0], [1], [0, 0, 1, 1], [], []>} : vector<8x96xf32>, vector<96x24xf32>, vector<8x24xf32> -> vector<8x24xf32>
    %c6 = arith.constant 6 : index
    %c0_35 = arith.constant 0 : index
    %90 = vector.load %arg3[%c6, %c0_35] : memref<8x96xf32, #tpu.memory_space<vmem>>, vector<1x24xf32>
    %91 = vector.broadcast %90 : vector<1x24xf32> to vector<8x24xf32>
    %92 = arith.addf %89, %91 : vector<8x24xf32>
    %c0_36 = arith.constant 0 : index
    %c0_37 = arith.constant 0 : index
    %93 = vector.load %arg4[%c0_36, %c0_37] : memref<8x24xf32, #tpu.memory_space<vmem>>, vector<8x24xf32>
    tpu.vector_store %arg4[%c0_36, %c0_37], %92 {strides = array<i32>} : memref<8x24xf32, #tpu.memory_space<vmem>>, vector<8x24xf32>,
    return
  }
}

</mosaic_0001>

<bundles_post_ra>
// kernel: tpu_custom_call.1
= control target key start
LH: loop header
LB: loop body
LE: loop exit
PB: predicated region body
PF: predicated region fallthrough
CT: control target
= control target key end

     0   :  { %v620_v2 = vmov 0.0|0.0   ;;  %vm621_vm0 = vmmov 0   ;;  %v622_v4 = vmov 0.0   ;;  %s783_s0 = inlined_call_operand.vmem [shape: f32[8,16], index: 0, kind: input, shape index: {}]   ;;  %s784_s1 = inlined_call_operand.vmem [shape: f32[80,96], index: 1, kind: input, shape index: {}]   ;;  %s785_s2 = inlined_call_operand.vmem [shape: f32[96,24], index: 2, kind: input, shape index: {}]   ;;  %s786_s3 = inlined_call_operand.vmem [shape: f32[8,96], index: 3, kind: input, shape index: {}]   ;;  %s787_s4 = inlined_call_operand.hbm [shape: f32[8,24], index: 4, kind: output, shape index: {}]  }
   0x1   :  { %v19_v0 = vld [vmem:[%s784_s1] sm:$0xff]  ;;  %v20_v1 = vld [vmem:[%s784_s1 + $0x8] sm:$0xff]  ;;  %553 = vmatprep.subr.bf16.mxu0 %v620_v2  ;;  %501 = vmatprep.mubr.msk.f32.mxu0 %vm621_vm0, %v622_v4 }
   0x2   :  { %v554_v3 = vpack.c.bf16 %v20_v1, %v19_v0 }
   0x3   :  { %9 = vsyncpa [#allocation3], 0  ;;  %568 = vmatprep.subr.bf16.mxu1 %v620_v2  ;;  %550 = vmatprep.mubr.msk.f32.mxu1 %vm621_vm0, %v622_v4  ;;  %v18_v5 = vld [vmem:[%s783_s0] sm:$0xff]  ;;  %vm21_vm1 = vcmask 130048   ;;  %v133_v6 = vld [vmem:[%s784_s1 + $0x10] sm:$0xff]  ;;  %vm97_vm2 = vcmask 261120   ;;  %v122_v33 = vlaneseq }
   0x4   :  { %555 = vmatpush3.bf16.msra.mxu0 %v554_v3  ;;  %v134_v7 = vld [vmem:[%s784_s1 + $0x18] sm:$0xff]  ;;  %v135_v9 = vld [vmem:[%s784_s1 + $0x20] sm:$0xff]  ;;  %v136_v10 = vld [vmem:[%s784_s1 + $0x28] sm:$0xff]  ;;  %vm325_vm3 = vcmask 785408   ;;  %s623_s18 = smov [#allocation2]   ;;  %vm450_vm4 = vcmask 195584  }
   0x5   :  { %556 = vmatprep.subr.bf16.mxu0 %v620_v2  ;;  %v557_v8 = vpack.c.bf16 %v134_v7, %v133_v6  ;;  %v560_v11 = vpack.c.bf16 %v136_v10, %v135_v9  ;;  %v123_v34 = vshrl.u32 %v122_v33, 7  ;;  %v95_v35 = vld [vmem:[%s786_s3] sm:$0x1]  ;;  %v96_v39 = vld [vmem:[%s786_s3 + $0x1] sm:$0x1]  ;;  %v246_v47 = vld [vmem:[%s784_s1 + $0x30] sm:$0xff] }
   0x6   :  { %v247_v48 = vld [vmem:[%s784_s1 + $0x38] sm:$0xff]  ;;  %v248_v50 = vld [vmem:[%s784_s1 + $0x40] sm:$0xff]  ;;  %v249_v51 = vld [vmem:[%s784_s1 + $0x48] sm:$0xff]  ;;  %s458_s19 = sshll.u32 %s623_s18, 4  ;;  %s459_s19 = int_to_ptr.vmem [resolvable:$true] %s458_s19 }
   0x7   :  { %502 = vmatmul.mubr.msk.f32.vlgmr.msra.gmra.mrb[0].mxu0 %vm21_vm1, %v18_v5  ;;  %v683_v36 = vsub.s32 0, %v123_v34  ;;  %v563_v49 = vpack.c.bf16 %v247_v48, %v246_v47  ;;  %v566_v52 = vpack.c.bf16 %v249_v51, %v248_v50  ;;  %v368_v34 = vld [vmem:[%s785_s2 + $0x40] sm:$0xff]  ;;  %s596_s20 = scalar_lea.vmem %s459_s19, 128  ;;  %p601_p1 = scmp.lt.s32.totalorder %s459_s19, %s459_s19 }
   0x8   :  { %512 = vmatprep.mubr.msk.f32.mxu0 %vm621_vm0, %v622_v4  ;;  %558 = vmatpush3.bf16.msra.mxu0 %v557_v8  ;;  %p597_p0 = scmp.ne.s32.totalorder %s459_s19, %s596_s20  ;;  %p602_p2 = scmp.lt.s32.totalorder %s596_s20, %s596_s20 }
   0x9   :  { %559 = vmatprep.subr.bf16.mxu0 %v620_v2 }
   0xa   :  { %p603_p3 = por %p602_p2, %p601_p1 }
   0xc   :  { %561 = vmatpush3.bf16.msra.mxu0 %v560_v11  ;;  %v210_v11 = vld [vmem:[%s786_s3 + $0x2] sm:$0x1]  ;;  %p604_p4 = pnand %p603_p3, %p597_p0 }
   0xd   :  { %562 = vmatprep.subr.bf16.mxu0 %v620_v2 }
  0xda   :  { %v91_v12 = vpop.f32.mrb[0].mxu0 }
  0xdb   :  { %v98_v13 = vsel %vm97_vm2, %v91_v12, 0.0  ;;  %v503_v14 = vpop.f32.mrb[1].mxu0 }
  0xdc   :  { %v99_v15 = vrot.slane %v98_v13, 4  ;;  %v211_v14 = vld [vmem:[%s786_s3 + $0x3] sm:$0x1] }
  0xde   :  { %v100_v16 = vadd.f32 %v99_v15, %v98_v13 }
  0xe0   :  { %v101_v17 = vrot.slane %v100_v16, 2 }
  0xe2   :  { %v102_v18 = vadd.f32 %v101_v17, %v100_v16 }
  0xe4   :  { %v103_v19 = vrot.slane %v102_v18, 1 }
  0xe6   :  { %v104_v20 = vadd.f32 %v103_v19, %v102_v18 }
  0xe8   :  { %v106_v21 = vmul.f32 0.125, %v104_v20 }
  0xea   :  { %v107_v22 = vsub.f32 %v91_v12, %v106_v21 }
  0xec   :  { %v108_v23 = vmul.f32 %v107_v22, %v107_v22  ;;  %v360_v22 = vld [vmem:[%s785_s2] sm:$0xff] }
  0xee   :  { %v109_v24 = vsel %vm97_vm2, %v108_v23, 0.0  ;;  %v361_v23 = vld [vmem:[%s785_s2 + $0x8] sm:$0xff] }
  0xef   :  { %v110_v25 = vrot.slane %v109_v24, 4 }
  0xf1   :  { %v111_v26 = vadd.f32 %v110_v25, %v109_v24  ;;  %v569_v24 = vpack.c.bf16 %v361_v23, %v360_v22  ;;  %v362_v25 = vld [vmem:[%s785_s2 + $0x10] sm:$0xff] }
  0xf3   :  { %v112_v27 = vrot.slane %v111_v26, 2  ;;  %570 = vmatpush3.bf16.msra.mxu1 %v569_v24 }
  0xf4   :  { %571 = vmatprep.subr.bf16.mxu1 %v620_v2 }
  0xf5   :  { %v113_v28 = vadd.f32 %v112_v27, %v111_v26  ;;  %v363_v26 = vld [vmem:[%s785_s2 + $0x18] sm:$0xff] }
  0xf6   :  { %v572_v27 = vpack.c.bf16 %v363_v26, %v362_v25 }
  0xf7   :  { %v114_v29 = vrot.slane %v113_v28, 1 }
  0xf8   :  { %573 = vmatpush3.bf16.msra.mxu1 %v572_v27 }
  0xf9   :  { %v115_v30 = vadd.f32 %v114_v29, %v113_v28  ;;  %574 = vmatprep.subr.bf16.mxu1 %v620_v2  ;;  %v364_v28 = vld [vmem:[%s785_s2 + $0x20] sm:$0xff]  ;;  %v365_v29 = vld [vmem:[%s785_s2 + $0x28] sm:$0xff] }
  0xfb   :  { %v116_v31 = vmul.f32 0.125, %v115_v30  ;;  %v575_v30 = vpack.c.bf16 %v365_v29, %v364_v28 }
  0xfd   :  { %v117_v32 = vadd.f32 1e-05, %v116_v31  ;;  %576 = vmatpush3.bf16.msra.mxu1 %v575_v30  ;;  %v366_v31 = vld [vmem:[%s785_s2 + $0x30] sm:$0xff] }
  0xfe   :  { %577 = vmatprep.subr.bf16.mxu1 %v620_v2 }
  0xff   :  { %590 = vrsqrt.f32 %v117_v32  ;;  %v367_v32 = vld [vmem:[%s785_s2 + $0x38] sm:$0xff] }
 0x100   :  { %v578_v33 = vpack.c.bf16 %v367_v32, %v366_v31 }
 0x102   :  { %579 = vmatpush3.bf16.msra.mxu1 %v578_v33 }
 0x103   :  { %580 = vmatprep.subr.bf16.mxu1 %v620_v2 }
 0x109   :  { %v591_v37 = vpop.eup %590 }
 0x10a   :  { %v119_v38 = vmul.f32 %v591_v37, %v95_v35  ;;  %v369_v35 = vld [vmem:[%s785_s2 + $0x48] sm:$0xff] }
 0x10b   :  { %v581_v37 = vpack.c.bf16 %v369_v35, %v368_v34 }
 0x10c   :  { %v120_v40 = vmul.f32 %v119_v38, %v106_v21  ;;  %v125_v41 = vrot.slane %v119_v38, %v683_v36  ;;  %v370_v38 = vld [vmem:[%s785_s2 + $0x50] sm:$0xff] }
 0x10d   :  { %582 = vmatpush3.bf16.msra.mxu1 %v581_v37 }
 0x10e   :  { %v121_v42 = vsub.f32 %v96_v39, %v120_v40  ;;  %v126_v43 = vmul.f32 %v125_v41, %v91_v12  ;;  %583 = vmatprep.subr.bf16.mxu1 %v620_v2  ;;  %v371_v39 = vld [vmem:[%s785_s2 + $0x58] sm:$0xff] }
 0x10f   :  { %v584_v40 = vpack.c.bf16 %v371_v39, %v370_v38 }
 0x110   :  { %v130_v44 = vrot.slane %v121_v42, %v683_v36 }
 0x111   :  { %585 = vmatpush3.bf16.msra.mxu1 %v584_v40 }
 0x112   :  { %v131_v45 = vadd.f32 %v130_v44, %v126_v43 }
 0x114   :  { %v132_v46 = vmax.f32 %v131_v45, 0.0 }
 0x116   :  { %513 = vmatmul.mubr.msk.f32.vlgmr.msra.gmra.mrb[2].mxu0 %vm97_vm2, %v132_v46 }
 0x117   :  { %523 = vmatprep.mubr.msk.f32.mxu0 %vm621_vm0, %v622_v4  ;;  %564 = vmatpush3.bf16.msra.mxu0 %v563_v49 }
 0x118   :  { %565 = vmatprep.subr.bf16.mxu0 %v620_v2 }
 0x11b   :  { %567 = vmatpush3.bf16.msra.mxu0 %v566_v52 }
 0x1e9   :  { %v206_v53 = vpop.f32.mrb[2].mxu0 }
 0x1ea   :  { %v212_v54 = vsel %vm97_vm2, %v206_v53, 0.0  ;;  %v514_v55 = vpop.f32.mrb[3].mxu0 }
 0x1eb   :  { %v213_v56 = vrot.slane %v212_v54, 4 }
 0x1ed   :  { %v214_v57 = vadd.f32 %v213_v56, %v212_v54 }
 0x1ef   :  { %v215_v58 = vrot.slane %v214_v57, 2 }
 0x1f1   :  { %v216_v59 = vadd.f32 %v215_v58, %v214_v57 }
 0x1f3   :  { %v217_v60 = vrot.slane %v216_v59, 1 }
 0x1f5   :  { %v218_v61 = vadd.f32 %v217_v60, %v216_v59 }
 0x1f7   :  { %v219_v62 = vmul.f32 0.125, %v218_v61  ;;  %v323_v61 = vld [vmem:[%s786_s3 + $0x4] sm:$0x1] }
 0x1f9   :  { %v220_v63 = vsub.f32 %v206_v53, %v219_v62 }
 0x1fb   :  { %v221_v0 = vmul.f32 %v220_v63, %v220_v63 }
 0x1fd   :  { %v222_v1 = vsel %vm97_vm2, %v221_v0, 0.0  ;;  %v324_v0 = vld [vmem:[%s786_s3 + $0x5] sm:$0x1] }
 0x1fe   :  { %v223_v3 = vrot.slane %v222_v1, 4 }
 0x200   :  { %v224_v4 = vadd.f32 %v223_v3, %v222_v1 }
 0x202   :  { %v225_v5 = vrot.slane %v224_v4, 2 }
 0x204   :  { %v226_v6 = vadd.f32 %v225_v5, %v224_v4 }
 0x206   :  { %v227_v7 = vrot.slane %v226_v6, 1 }
 0x208   :  { %v228_v8 = vadd.f32 %v227_v7, %v226_v6 }
 0x20a   :  { %v229_v9 = vmul.f32 0.125, %v228_v8 }
 0x20c   :  { %v230_v10 = vadd.f32 1e-05, %v229_v9  ;;  %v469_v9 = vld [vmem:[%s786_s3 + $0x6] ss:$0 sm:$0xff] }
 0x20e   :  { %592 = vrsqrt.f32 %v230_v10 }
 0x218   :  { %v593_v12 = vpop.eup %592 }
 0x219   :  { %v232_v13 = vmul.f32 %v593_v12, %v210_v11 }
 0x21b   :  { %v233_v15 = vmul.f32 %v232_v13, %v219_v62  ;;  %v238_v16 = vrot.slane %v232_v13, %v683_v36 }
 0x21d   :  { %v234_v17 = vsub.f32 %v211_v14, %v233_v15  ;;  %v239_v18 = vmul.f32 %v238_v16, %v206_v53 }
 0x21f   :  { %v243_v19 = vrot.slane %v234_v17, %v683_v36 }
 0x221   :  { %v244_v20 = vadd.f32 %v243_v19, %v239_v18 }
 0x223   :  { %v245_v21 = vmax.f32 %v244_v20, 0.0 }
 0x225   :  { %524 = vmatmul.mubr.msk.f32.vlgmr.msra.gmra.mrb[4].mxu0 %vm97_vm2, %v245_v21 }
 0x2f8   :  { %v319_v41 = vpop.f32.mrb[4].mxu0 }
 0x2f9   :  { %v326_v42 = vsel %vm325_vm3, %v319_v41, 0.0  ;;  %v525_v43 = vpop.f32.mrb[5].mxu0 }
 0x2fa   :  { %v327_v44 = vrot.slane %v326_v42, 4 }
 0x2fc   :  { %v328_v45 = vadd.f32 %v327_v44, %v326_v42 }
 0x2fe   :  { %v329_v46 = vrot.slane %v328_v45, 2 }
 0x300   :  { %v330_v47 = vadd.f32 %v329_v46, %v328_v45 }
 0x302   :  { %v331_v2 = vrot.slane %v330_v47, 1 }
 0x304   :  { %v332_v48 = vadd.f32 %v331_v2, %v330_v47 }
 0x306   :  { %v333_v49 = vmul.f32 0.125, %v332_v48 }
 0x308   :  { %v334_v50 = vsub.f32 %v319_v41, %v333_v49 }
 0x30a   :  { %v335_v51 = vmul.f32 %v334_v50, %v334_v50 }
 0x30c   :  { %v336_v52 = vsel %vm325_vm3, %v335_v51, 0.0 }
 0x30d   :  { %v337_v53 = vrot.slane %v336_v52, 4 }
 0x30f   :  { %v338_v54 = vadd.f32 %v337_v53, %v336_v52 }
 0x311   :  { %v339_v55 = vrot.slane %v338_v54, 2 }
 0x313   :  { %v340_v56 = vadd.f32 %v339_v55, %v338_v54 }
 0x315   :  { %v341_v57 = vrot.slane %v340_v56, 1 }
 0x317   :  { %v342_v58 = vadd.f32 %v341_v57, %v340_v56 }
 0x319   :  { %v343_v59 = vmul.f32 0.125, %v342_v58 }
 0x31b   :  { %v344_v60 = vadd.f32 1e-05, %v343_v59 }
 0x31d   :  { %594 = vrsqrt.f32 %v344_v60 }
 0x327   :  { %v595_v62 = vpop.eup %594 }
 0x328   :  { %v346_v63 = vmul.f32 %v595_v62, %v323_v61 }
 0x32a   :  { %v347_v1 = vmul.f32 %v346_v63, %v333_v49  ;;  %v352_v3 = vrot.slane %v346_v63, %v683_v36 }
 0x32c   :  { %v348_v4 = vsub.f32 %v324_v0, %v347_v1  ;;  %v353_v5 = vmul.f32 %v352_v3, %v319_v41 }
 0x32e   :  { %v357_v6 = vrot.slane %v348_v4, %v683_v36 }
 0x330   :  { %v358_v7 = vadd.f32 %v357_v6, %v353_v5 }
 0x332   :  { %v359_v8 = vmax.f32 %v358_v7, 0.0 }
 0x334   :  { %551 = vmatmul.mubr.msk.f32.vlgmr.msra.gmra.mrb[0].mxu1 %vm325_vm3, %v359_v8 }
 0x407   :  { %v446_v10 = vpop.f32.mrb[0].mxu1 }
 0x408   :  { %v447_v11 = vadd.f32 %v469_v9, %v446_v10  ;;  %v552_v12 = vpop.f32.mrb[1].mxu1 }
 0x40a   :  { %451 = vst.msk [vmem:[#allocation2] sm:$0xff] %vm450_vm4, %v447_v11 }
 0x40b   :  { %607 = shalt.err (!%p604_p4)
}
 0x40c   :  { %s608_s23 = scalar_lea.hbm %s787_s4, 128 }
 0x40d   :  { %p609_p5 = scmp.ne.s32.totalorder %s787_s4, %s608_s23  ;;  %p612_p6 = scmp.lt.u32.totalorder %s608_s23, %s787_s4 }
 0x40f   :  { %p614_p7 = pnand %p612_p6, %p609_p5 }
 0x411   :  { %617 = shalt.err (!%p614_p7)
}
 0x412   :  { %461 = dma.vmem_to_hbm [thread:$0]  %s459_s19, 128, %s787_s4, [#allocation3]  }
 0x413   :  { %618 = dma.done.wait [#allocation3], 128  }
 0x414   :  { %619 = vsyncadd [#allocation3], 4294967168 }
 0x415   :  { %465 = vsyncpa [#allocation3], 1 }

</bundles_post_ra>
